<compile_context>
chip_gen: v5e
topology: v5e:2x2
jax: 0.10.0
libtpu: 0.0.40
codegen_flags: <defaults>
</compile_context>

<pallas_src>
import jax
import jax.numpy as jnp
from jax import lax
from jax.experimental import pallas as pl
from jax.experimental.pallas import tpu as pltpu

OUT_DIM = 512
_PALLAS_MIN_BATCH = 1024   # below this, custom-call dispatch > the actual work


def _round_up(n, m):
    return ((n + m - 1) // m) * m


def _pose_direction_kernel(x_ref, qt_ref, o_ref):
    # x_ref : (TB, P)    f32 batch tile
    # qt_ref: (P, 512)   f32 lane-dense Q^T, resident in VMEM (constant index_map)
    # o_ref : (TB, 512)  lane-dense output tile
    # out[b, :] = sum_i x[b, i] * Q[:, i]  ==  x @ Q^T
    o_ref[...] = jnp.dot(
        x_ref[...], qt_ref[...],
        preferred_element_type=jnp.float32,
    ).astype(o_ref.dtype)


def _cholesky_qr2(w):
    """Reduced QR of tall-skinny w (512, P) via CholeskyQR2.

    Sign convention: diag(R) > 0.  QR is only unique up to per-column signs,
    so columns of Q may differ in sign from torch.linalg.qr / LAPACK output.
    The second pass restores orthogonality to ~eps even when kappa(w) is
    large (plain Cholesky-QR loses ~kappa^2 * eps).
    """
    # TODO(synk): QR / Cholesky / triangular solve of a 512xP matrix has no
    # clean Pallas TPU formulation at this size; done in plain JAX (cheap glue).
    def _cholqr(a):
        gram = jnp.matmul(a.T, a, precision=lax.Precision.HIGHEST)   # (P, P) SPD
        l = jnp.linalg.cholesky(gram)                                 # G = L L^T
        # Q = A @ (L^T)^{-1}  -> right-side triangular solve, no transposes.
        return lax.linalg.triangular_solve(l, a, left_side=False, lower=True,
                                           transpose_a=True)
    return _cholqr(_cholqr(w))                                        # (512, P)


def pose_direction_forward(x, weight, *, block_rows=4096, use_pallas=None,
                           out_dtype=jnp.float32):
    """Forward pass of Pose_Direction.

    x:         (batch, pose_dim) or None
    weight:    (512, pose_dim)
    out_dtype: float32 (default, matches PyTorch) or bfloat16 (fast path:
               halves the HBM writeback, which is the kernel's bottleneck).
    Returns (batch, 512) array of `out_dtype`, or Q (512, pose_dim) f32 if x is None.
    """
    w = weight.astype(jnp.float32) + 1e-8
    q = _cholesky_qr2(w)                      # (512, P) float32

    if x is None:
        return q

    x = x.astype(jnp.float32)
    b, p = x.shape
    qt = q.T                                  # (P, 512) lane-dense, one-time wrapper glue

    if use_pallas is None:
        use_pallas = b >= _PALLAS_MIN_BATCH
    if not use_pallas:
        # Small-batch fast path: ~KFLOPs of work, let XLA fuse it with neighbors.
        out = jnp.dot(x, qt, precision=lax.Precision.HIGHEST,
                      preferred_element_type=jnp.float32)
        return out.astype(out_dtype)

    # --- batch tiling --------------------------------------------------------
    # tb multiple of 32: covers f32/bf16 (and future int8/fp8) output sublane
    # packing so edge tiles never force masked partial stores.
    tb = min(int(block_rows), _round_up(b, 32))
    tb = max(32, _round_up(tb, 32))
    n_tiles = pl.cdiv(b, tb)
    if n_tiles == 1 and b > 32:
        # v7x megacore shards the batch grid across 2 TensorCores: never ship
        # a size-1 grid (one core would sit idle). No effect on v5e/v6e.
        tb = max(32, _round_up(pl.cdiv(b, 2), 32))
        n_tiles = pl.cdiv(b, tb)
    elif n_tiles > 1 and n_tiles % 2 == 1:
        # Best-effort: an even grid balances the two v7x TCs.
        tb_even = max(32, _round_up(pl.cdiv(b, n_tiles + 1), 32))
        if pl.cdiv(b, tb_even) % 2 == 0:
            tb = tb_even
            n_tiles = pl.cdiv(b, tb)

    # No input padding / no output slicing: Pallas masks the ragged edge block
    # (OOB input rows are don't-care, OOB output rows are dropped; each output
    # row depends only on its own input row, so no contamination).
    out_itemsize = jnp.dtype(out_dtype).itemsize
    vmem_est = 2 * (tb * _round_up(p, 128) * 4          # x tile, double-buffered (lane-padded)
                    + tb * OUT_DIM * out_itemsize       # out tile, double-buffered
                    + _round_up(p, 8) * OUT_DIM * 4)    # resident Q^T
    # Raise the scoped-VMEM limit past v5e's 16 MiB default when the tile
    # budget needs it; cap below v7x's 64 MiB physical VMEM per TC.
    vmem_limit = int(min(max(vmem_est + (4 << 20), 16 << 20), 48 << 20))

    out = pl.pallas_call(
        _pose_direction_kernel,
        out_shape=jax.ShapeDtypeStruct((b, OUT_DIM), out_dtype),
        grid=(n_tiles,),
        in_specs=[
            pl.BlockSpec((tb, p), lambda i: (i, 0)),        # batch tile of x
            pl.BlockSpec((p, OUT_DIM), lambda i: (0, 0)),   # Q^T, resident (~16 KiB)
        ],
        out_specs=pl.BlockSpec((tb, OUT_DIM), lambda i: (i, 0)),
        compiler_params=pltpu.CompilerParams(
            dimension_semantics=("parallel",),              # v7x: shard batch across TCs
            vmem_limit_bytes=vmem_limit),
    )(x, qt)
    return out


if __name__ == "__main__":
    key = jax.random.PRNGKey(0)
    k_w, k_x1, k_x2, k_x3 = jax.random.split(key, 4)

    pose_dim = 8
    weight = jax.random.normal(k_w, (OUT_DIM, pose_dim), dtype=jnp.float32)

    # Reference Q: Householder QR, sign-normalized to diag(R) > 0 (QR is only
    # unique up to per-column signs; this matches CholeskyQR2's convention).
    w_ref = weight + 1e-8
    q_h, r_h = jnp.linalg.qr(w_ref)
    sgn = jnp.sign(jnp.diagonal(r_h))
    sgn = jnp.where(sgn == 0, 1.0, sgn)
    q_ref = q_h * sgn[None, :]

    # 1) Small-batch fast path (B=4): full diag_embed -> matmul -> sum reference.
    batch_small = 4
    x_small = jax.random.normal(k_x1, (batch_small, pose_dim), dtype=jnp.float32)
    out_small = jax.block_until_ready(pose_direction_forward(x_small, weight))
    x_diag = jax.vmap(jnp.diag)(x_small)                            # (B, P, P)
    ref_small = jnp.sum(
        jnp.matmul(x_diag, q_ref.T, precision=lax.Precision.HIGHEST), axis=1)
    assert out_small.shape == (batch_small, OUT_DIM), out_small.shape
    assert out_small.dtype == jnp.float32, out_small.dtype
    assert jnp.allclose(out_small, ref_small, atol=1e-4, rtol=1e-4), \
        "fast-path mismatch vs reference"

    # 2) Ragged Pallas path: B=500 is NOT a multiple of the 256-row tile, so
    #    this exercises Pallas's masking of the edge block (no pad / no slice).
    batch_big = 500
    x_big = jax.random.normal(k_x2, (batch_big, pose_dim), dtype=jnp.float32)
    out_big = jax.block_until_ready(
        pose_direction_forward(x_big, weight, block_rows=256, use_pallas=True))
    ref_big = jnp.matmul(x_big, q_ref.T, precision=lax.Precision.HIGHEST)
    assert out_big.shape == (batch_big, OUT_DIM), out_big.shape
    assert out_big.dtype == jnp.float32, out_big.dtype
    assert jnp.allclose(out_big, ref_big, atol=2e-3, rtol=2e-3), \
        "pallas ragged-path mismatch vs reference"

    # 3) bfloat16 output fast path (halves the dominant HBM writeback).
    batch_bf = 1536
    x_bf = jax.random.normal(k_x3, (batch_bf, pose_dim), dtype=jnp.float32)
    out_bf = jax.block_until_ready(
        pose_direction_forward(x_bf, weight, use_pallas=True,
                               out_dtype=jnp.bfloat16))
    ref_bf = jnp.matmul(x_bf, q_ref.T, precision=lax.Precision.HIGHEST)
    assert out_bf.shape == (batch_bf, OUT_DIM), out_bf.shape
    assert out_bf.dtype == jnp.bfloat16, out_bf.dtype
    assert jnp.allclose(out_bf.astype(jnp.float32), ref_bf,
                        atol=1.5e-2, rtol=2e-2), "bf16-path mismatch vs reference"

    # 4) `input is None` path returns Q directly; check shape + orthonormality.
    q_only = jax.block_until_ready(pose_direction_forward(None, weight))
    assert q_only.shape == (OUT_DIM, pose_dim), q_only.shape
    assert jnp.allclose(q_only, q_ref, atol=1e-4, rtol=1e-4), "Q mismatch vs QR"
    assert jnp.allclose(q_only.T @ q_only, jnp.eye(pose_dim), atol=1e-4), \
        "Q columns not orthonormal"

    print("KERNEL_OK")
</pallas_src>

<mosaic_0001>
module attributes {stable_mosaic.version = 11 : i64} {
  func.func @_pose_direction_kernel(%arg0: i32, %arg1: memref<256x8xf32, #tpu.memory_space<vmem>>, %arg2: memref<8x512xf32, #tpu.memory_space<vmem>>, %arg3: memref<256x512xf32, #tpu.memory_space<vmem>>) attributes {dimension_semantics = [#tpu.dimension_semantics<parallel>], iteration_bounds = array<i64: 2>, scalar_prefetch = 0 : i64, scratch_operands = 0 : i64, tpu.core_type = #tpu.core_type<tc>, window_params = [{transform_indices = @transform_0, window_bounds = array<i64: 256, 8>}, {pipeline_mode = #tpu.pipeline_mode<synchronous>, transform_indices = @transform_1, window_bounds = array<i64: 8, 512>}, {transform_indices = @transform_2, window_bounds = array<i64: 256, 512>}]} {
    %c0 = arith.constant 0 : index
    %c0_0 = arith.constant 0 : index
    %0 = vector.load %arg1[%c0, %c0_0] : memref<256x8xf32, #tpu.memory_space<vmem>>, vector<256x8xf32>
    %c0_1 = arith.constant 0 : index
    %c0_2 = arith.constant 0 : index
    %1 = vector.load %arg2[%c0_1, %c0_2] : memref<8x512xf32, #tpu.memory_space<vmem>>, vector<8x512xf32>
    %cst = arith.constant dense<0.000000e+00> : vector<256x512xf32>
    %2 = tpu.matmul %0, %1, %cst {dimension_numbers = #tpu.dot_dimension_numbers<[1], [0], [0], [1], [0, 0, 1, 1], [], []>} : vector<256x8xf32>, vector<8x512xf32>, vector<256x512xf32> -> vector<256x512xf32>
    %c0_3 = arith.constant 0 : index
    %c0_4 = arith.constant 0 : index
    %3 = vector.load %arg3[%c0_3, %c0_4] : memref<256x512xf32, #tpu.memory_space<vmem>>, vector<256x512xf32>
    tpu.vector_store %arg3[%c0_3, %c0_4], %2 {strides = array<i32>} : memref<256x512xf32, #tpu.memory_space<vmem>>, vector<256x512xf32>,
    return
  }
  func.func @transform_0(%arg0: i32) -> (i32, i32) {
    %c0_i32 = arith.constant 0 : i32
    %c0_i32_0 = arith.constant 0 : i32
    return %arg0, %c0_i32 : i32, i32
  }
  func.func @transform_1(%arg0: i32) -> (i32, i32) {
    %c0_i32 = arith.constant 0 : i32
    %c0_i32_0 = arith.constant 0 : i32
    %c0_i32_1 = arith.constant 0 : i32
    return %c0_i32, %c0_i32_0 : i32, i32
  }
  func.func @transform_2(%arg0: i32) -> (i32, i32) {
    %c0_i32 = arith.constant 0 : i32
    %c0_i32_0 = arith.constant 0 : i32
    return %arg0, %c0_i32 : i32, i32
  }
}

</mosaic_0001>

<bundles_post_ra>
// kernel: tpu_custom_call.1
= control target key start
LH: loop header
LB: loop body
LE: loop exit
PB: predicated region body
PF: predicated region fallthrough
CT: control target
= control target key end

     0   :  { %7 = vsyncpa [#allocation3], 0  ;;  %s1678_s0 = inlined_call_operand.vmem [shape: f32[500,8], index: 0, kind: input, shape index: {}]   ;;  %s1679_s1 = inlined_call_operand.vmem [shape: f32[8,512], index: 1, kind: input, shape index: {}]   ;;  %s1680_s2 = inlined_call_operand.hbm [shape: f32[500,512], index: 2, kind: output, shape index: {}]  }
   0x1   :  { %9 = vsyncpa [#allocation3 + $0x1], 0  ;;  %s1252_s9 = smov 0   ;;  %s1254_s10 = smov 0  }
   0x2   :  { %s1256_s11 = smov 0   ;;  %s1258_s12 = smov 0  }
   0x3 LB: > { %s1273_s13 = sadd.s32 4294967295, %s1232_s12   ;;  %s970_s14 = sadd.s32 4294967294, %s1232_s12   ;;  %s1232_s12 = sphi %s1258_s12, %s1687_s12   ;;  %s1228_s11 = sphi %s1256_s11, %s1686_s11   ;;  %s1224_s10 = sphi %s1254_s10, %s1685_s10   ;;  %s1220_s9 = sphi %s1252_s9, %s1684_s9  }
   0x4   : > { %s1277_s15 = sadd.s32 1, %s1232_s12   ;;  %s69_s16 = sadd.s32 1, %s1228_s11 }
   0x5   : > { %s66_s17 = ssub.s32 %s1232_s12, %s1277_s15  ;;  %p79_p0 = scmp.ne.s32.totalorder %s1228_s11, %s1224_s10 }
   0x6   : > { %p67_p1 = scmp.eq.s32.totalorder %s66_s17, 0  ;;  %p80_p2 = scmp.eq.s32.totalorder %s1273_s13, 1 }
   0x7   : > { %p85_p3 = scmp.ne.s32.totalorder %s1224_s10, %s1220_s9  ;;  %p86_p4 = scmp.eq.s32.totalorder %s970_s14, 1 }
   0x8   : > { %s1288_s18 = scalar_select %p67_p1, %s1228_s11, %s69_s16  }
   0x9   : > { %p1290_p5 = por %p80_p2, %p79_p0  ;;  %p1294_p6 = por %p86_p4, %p85_p3 }
   0xa   : > { %p973_p7 = scmp.ge.s32.totalorder %s1232_s12, 1  ;;  %p124_p8 = scmp.lt.s32.totalorder %s1232_s12, 3 }
   0xc   : > { %p125_p9 = pnand %p973_p7, %p124_p8 }
   0xd   : > { %s1307_s25 = sshll.u32 (!%p125_p9), %s1273_s13, 5  ;;  %s147_s7 = sand.u32 (!%p125_p9), 1, %s1224_s10  }
   0xe   : > { %128 = sbr.rel (%p125_p9) target bundleno = 437 (0x1b5), region = 28  ;;  %p155_p10 = scmp.lt.s32.totalorder (!%p125_p9), %s1307_s25, 62 }
   0xf   : > { %s974_s8 = sshll.u32 (!%p125_p9), %s147_s7, 10  ;;  %s1617_s16 = scalar_lea.sflag (!%p125_p9), [#allocation3], %s147_s7 }
  0x10   : > { %s1406_s14 = scalar_lea.vmem (!%p125_p9), [#allocation2], %s974_s8 }
  0x13   : > { %v204_v0 = vld [vmem:[%s1679_s1 + $0x10] sm:$0xff]  ;;  %v205_v1 = vld [vmem:[%s1679_s1 + $0x18] sm:$0xff]  ;;  %v202_v2 = vld [vmem:[%s1679_s1] sm:$0xff]  ;;  %s156_s30 = scalar_select %p155_p10, %s1307_s25, 62  ;;  %vm206_vm0 = vcmask 64512  }
  0x14   : > { %544 = vmatpush.msra.mxu2 %v204_v0  ;;  %657 = vmatpush.msra.mxu3 %v205_v1  ;;  %v203_v3 = vld [vmem:[%s1679_s1 + $0x8] sm:$0xff]  ;;  %s892_s17 = ssub.s32 (%p1290_p5), 63, %s1307_s25 }
  0x15   : > { %318 = vmatpush.msra.mxu0 %v202_v2  ;;  %431 = vmatpush.msra.mxu1 %v203_v3  ;;  %s976_s3 = sshll.u32 %s156_s30, 3  ;;  %p893_p11 = scmp.lt.s32.totalorder (%p1290_p5), %s892_s17, 32 }
  0x16   : > { %s1320_s6 = scalar_lea.vmem %s1678_s0, %s976_s3 }
  0x17   : > { %v170_v4 = vld [vmem:[%s1320_s6] sm:$0xff]  ;;  %v171_v5 = vld [vmem:[%s1320_s6 + $0x8] sm:$0xff]  ;;  %v172_v6 = vld [vmem:[%s1320_s6 + $0x10] sm:$0xff] }
  0x18   : > { %1041 = vmatmul.msk.f32.vlgmr.msra.gmra.mxu2 %vm206_vm0, %v170_v4  ;;  %1073 = vmatmul.msk.f32.vlgmr.msra.gmra.mxu3 %vm206_vm0, %v170_v4  ;;  %v173_v7 = vld [vmem:[%s1320_s6 + $0x18] sm:$0xff]  ;;  %v174_v8 = vld [vmem:[%s1320_s6 + $0x20] sm:$0xff]  ;;  %v175_v9 = vld [vmem:[%s1320_s6 + $0x28] sm:$0xff] }
  0x19   : > { %977 = vmatmul.msk.f32.vlgmr.msra.gmra.mxu0 %vm206_vm0, %v170_v4  ;;  %1009 = vmatmul.msk.f32.vlgmr.msra.gmra.mxu1 %vm206_vm0, %v170_v4  ;;  %v176_v10 = vld [vmem:[%s1320_s6 + $0x30] sm:$0xff]  ;;  %v177_v11 = vld [vmem:[%s1320_s6 + $0x38] sm:$0xff]  ;;  %v178_v12 = vld [vmem:[%s1320_s6 + $0x40] sm:$0xff] }
  0x1a   : > { %v179_v13 = vld [vmem:[%s1320_s6 + $0x48] sm:$0xff]  ;;  %v180_v14 = vld [vmem:[%s1320_s6 + $0x50] sm:$0xff]  ;;  %v181_v15 = vld [vmem:[%s1320_s6 + $0x58] sm:$0xff] }
  0x1b   : > { %v182_v16 = vld [vmem:[%s1320_s6 + $0x60] sm:$0xff]  ;;  %v183_v17 = vld [vmem:[%s1320_s6 + $0x68] sm:$0xff]  ;;  %v184_v18 = vld [vmem:[%s1320_s6 + $0x70] sm:$0xff] }
  0x1c   : > { %v185_v19 = vld [vmem:[%s1320_s6 + $0x78] sm:$0xff]  ;;  %v186_v20 = vld [vmem:[%s1320_s6 + $0x80] sm:$0xff]  ;;  %v187_v25 = vld [vmem:[%s1320_s6 + $0x88] sm:$0xff] }
  0x1d   : > { %v188_v30 = vld [vmem:[%s1320_s6 + $0x90] sm:$0xff]  ;;  %v189_v35 = vld [vmem:[%s1320_s6 + $0x98] sm:$0xff]  ;;  %v190_v40 = vld [vmem:[%s1320_s6 + $0xa0] sm:$0xff] }
  0x1e   : > { %v191_v45 = vld [vmem:[%s1320_s6 + $0xa8] sm:$0xff]  ;;  %v192_v50 = vld [vmem:[%s1320_s6 + $0xb0] sm:$0xff]  ;;  %v193_v55 = vld [vmem:[%s1320_s6 + $0xb8] sm:$0xff] }
  0x1f   : > { %v194_v60 = vld [vmem:[%s1320_s6 + $0xc0] sm:$0xff]  ;;  %v195_v1 = vld [vmem:[%s1320_s6 + $0xc8] sm:$0xff] }
  0x20   : > { %1042 = vmatmul.msk.f32.gmra.mxu2 %vm206_vm0, %v171_v5  ;;  %1074 = vmatmul.msk.f32.gmra.mxu3 %vm206_vm0, %v171_v5 }
  0x21   : > { %978 = vmatmul.msk.f32.gmra.mxu0 %vm206_vm0, %v171_v5  ;;  %1010 = vmatmul.msk.f32.gmra.mxu1 %vm206_vm0, %v171_v5 }
  0x28   : > { %1043 = vmatmul.msk.f32.gmra.mxu2 %vm206_vm0, %v172_v6  ;;  %1075 = vmatmul.msk.f32.gmra.mxu3 %vm206_vm0, %v172_v6 }
  0x29   : > { %979 = vmatmul.msk.f32.gmra.mxu0 %vm206_vm0, %v172_v6  ;;  %1011 = vmatmul.msk.f32.gmra.mxu1 %vm206_vm0, %v172_v6  ;;  %v196_v6 = vld [vmem:[%s1320_s6 + $0xd0] sm:$0xff] }
  0x30   : > { %1044 = vmatmul.msk.f32.gmra.mxu2 %vm206_vm0, %v173_v7  ;;  %1076 = vmatmul.msk.f32.gmra.mxu3 %vm206_vm0, %v173_v7 }
  0x31   : > { %980 = vmatmul.msk.f32.gmra.mxu0 %vm206_vm0, %v173_v7  ;;  %1012 = vmatmul.msk.f32.gmra.mxu1 %vm206_vm0, %v173_v7 }
  0x38   : > { %1045 = vmatmul.msk.f32.gmra.mxu2 %vm206_vm0, %v174_v8  ;;  %1077 = vmatmul.msk.f32.gmra.mxu3 %vm206_vm0, %v174_v8 }
  0x39   : > { %981 = vmatmul.msk.f32.gmra.mxu0 %vm206_vm0, %v174_v8  ;;  %1013 = vmatmul.msk.f32.gmra.mxu1 %vm206_vm0, %v174_v8 }
  0x40   : > { %1046 = vmatmul.msk.f32.gmra.mxu2 %vm206_vm0, %v175_v9  ;;  %1078 = vmatmul.msk.f32.gmra.mxu3 %vm206_vm0, %v175_v9 }
  0x41   : > { %982 = vmatmul.msk.f32.gmra.mxu0 %vm206_vm0, %v175_v9  ;;  %1014 = vmatmul.msk.f32.gmra.mxu1 %vm206_vm0, %v175_v9 }
  0x48   : > { %1047 = vmatmul.msk.f32.gmra.mxu2 %vm206_vm0, %v176_v10  ;;  %1079 = vmatmul.msk.f32.gmra.mxu3 %vm206_vm0, %v176_v10 }
  0x49   : > { %983 = vmatmul.msk.f32.gmra.mxu0 %vm206_vm0, %v176_v10  ;;  %1015 = vmatmul.msk.f32.gmra.mxu1 %vm206_vm0, %v176_v10 }
  0x50   : > { %1048 = vmatmul.msk.f32.gmra.mxu2 %vm206_vm0, %v177_v11  ;;  %1080 = vmatmul.msk.f32.gmra.mxu3 %vm206_vm0, %v177_v11 }
  0x51   : > { %984 = vmatmul.msk.f32.gmra.mxu0 %vm206_vm0, %v177_v11  ;;  %1016 = vmatmul.msk.f32.gmra.mxu1 %vm206_vm0, %v177_v11  ;;  %v197_v11 = vld [vmem:[%s1320_s6 + $0xd8] sm:$0xff] }
  0x58   : > { %1049 = vmatmul.msk.f32.gmra.mxu2 %vm206_vm0, %v178_v12  ;;  %1081 = vmatmul.msk.f32.gmra.mxu3 %vm206_vm0, %v178_v12 }
  0x59   : > { %985 = vmatmul.msk.f32.gmra.mxu0 %vm206_vm0, %v178_v12  ;;  %1017 = vmatmul.msk.f32.gmra.mxu1 %vm206_vm0, %v178_v12 }
  0x60   : > { %1050 = vmatmul.msk.f32.gmra.mxu2 %vm206_vm0, %v179_v13  ;;  %1082 = vmatmul.msk.f32.gmra.mxu3 %vm206_vm0, %v179_v13 }
  0x61   : > { %986 = vmatmul.msk.f32.gmra.mxu0 %vm206_vm0, %v179_v13  ;;  %1018 = vmatmul.msk.f32.gmra.mxu1 %vm206_vm0, %v179_v13 }
  0x68   : > { %1051 = vmatmul.msk.f32.gmra.mxu2 %vm206_vm0, %v180_v14  ;;  %1083 = vmatmul.msk.f32.gmra.mxu3 %vm206_vm0, %v180_v14 }
  0x69   : > { %987 = vmatmul.msk.f32.gmra.mxu0 %vm206_vm0, %v180_v14  ;;  %1019 = vmatmul.msk.f32.gmra.mxu1 %vm206_vm0, %v180_v14 }
  0x70   : > { %1052 = vmatmul.msk.f32.gmra.mxu2 %vm206_vm0, %v181_v15  ;;  %1084 = vmatmul.msk.f32.gmra.mxu3 %vm206_vm0, %v181_v15 }
  0x71   : > { %988 = vmatmul.msk.f32.gmra.mxu0 %vm206_vm0, %v181_v15  ;;  %1020 = vmatmul.msk.f32.gmra.mxu1 %vm206_vm0, %v181_v15 }
  0x78   : > { %1053 = vmatmul.msk.f32.gmra.mxu2 %vm206_vm0, %v182_v16  ;;  %1085 = vmatmul.msk.f32.gmra.mxu3 %vm206_vm0, %v182_v16 }
  0x79   : > { %989 = vmatmul.msk.f32.gmra.mxu0 %vm206_vm0, %v182_v16  ;;  %1021 = vmatmul.msk.f32.gmra.mxu1 %vm206_vm0, %v182_v16  ;;  %v198_v16 = vld [vmem:[%s1320_s6 + $0xe0] sm:$0xff] }
  0x80   : > { %1054 = vmatmul.msk.f32.gmra.mxu2 %vm206_vm0, %v183_v17  ;;  %1086 = vmatmul.msk.f32.gmra.mxu3 %vm206_vm0, %v183_v17 }
  0x81   : > { %990 = vmatmul.msk.f32.gmra.mxu0 %vm206_vm0, %v183_v17  ;;  %1022 = vmatmul.msk.f32.gmra.mxu1 %vm206_vm0, %v183_v17 }
  0x88   : > { %1055 = vmatmul.msk.f32.gmra.mxu2 %vm206_vm0, %v184_v18  ;;  %1087 = vmatmul.msk.f32.gmra.mxu3 %vm206_vm0, %v184_v18 }
  0x89   : > { %991 = vmatmul.msk.f32.gmra.mxu0 %vm206_vm0, %v184_v18  ;;  %1023 = vmatmul.msk.f32.gmra.mxu1 %vm206_vm0, %v184_v18 }
  0x90   : > { %1056 = vmatmul.msk.f32.gmra.mxu2 %vm206_vm0, %v185_v19  ;;  %1088 = vmatmul.msk.f32.gmra.mxu3 %vm206_vm0, %v185_v19 }
  0x91   : > { %992 = vmatmul.msk.f32.gmra.mxu0 %vm206_vm0, %v185_v19  ;;  %1024 = vmatmul.msk.f32.gmra.mxu1 %vm206_vm0, %v185_v19 }
  0x96   : > { %v320_v21 = vpop.f32.mrf.mxu0  ;;  %v433_v22 = vpop.f32.mrf.mxu1 }
  0x97   : > { %755 = vst [vmem:[%s1406_s14] sm:$0xff] %v320_v21  ;;  %v199_v21 = vld [vmem:[%s1320_s6 + $0xe8] sm:$0xff] }
  0x98   : > { %1057 = vmatmul.msk.f32.gmra.mxu2 %vm206_vm0, %v186_v20  ;;  %1089 = vmatmul.msk.f32.gmra.mxu3 %vm206_vm0, %v186_v20  ;;  %756 = vst [vmem:[%s1406_s14 + $0x8] sm:$0xff] %v433_v22 }
  0x99   : > { %993 = vmatmul.msk.f32.gmra.mxu0 %vm206_vm0, %v186_v20  ;;  %1025 = vmatmul.msk.f32.gmra.mxu1 %vm206_vm0, %v186_v20 }
  0x9b   : > { %v546_v23 = vpop.f32.mrf.mxu2  ;;  %v659_v24 = vpop.f32.mrf.mxu3 }
  0x9c   : > { %757 = vst [vmem:[%s1406_s14 + $0x10] sm:$0xff] %v546_v23 }
  0x9d   : > { %758 = vst [vmem:[%s1406_s14 + $0x18] sm:$0xff] %v659_v24 }
  0x9e   : > { %v323_v26 = vpop.f32.mrf.mxu0  ;;  %v436_v27 = vpop.f32.mrf.mxu1 }
  0x9f   : > { %759 = vst [vmem:[%s1406_s14 + $0x20] sm:$0xff] %v323_v26  ;;  %v200_v26 = vld [vmem:[%s1320_s6 + $0xf0] sm:$0xff] }
  0xa0   : > { %1058 = vmatmul.msk.f32.gmra.mxu2 %vm206_vm0, %v187_v25  ;;  %1090 = vmatmul.msk.f32.gmra.mxu3 %vm206_vm0, %v187_v25  ;;  %760 = vst [vmem:[%s1406_s14 + $0x28] sm:$0xff] %v436_v27 }
  0xa1   : > { %994 = vmatmul.msk.f32.gmra.mxu0 %vm206_vm0, %v187_v25  ;;  %1026 = vmatmul.msk.f32.gmra.mxu1 %vm206_vm0, %v187_v25 }
  0xa3   : > { %v549_v28 = vpop.f32.mrf.mxu2  ;;  %v662_v29 = vpop.f32.mrf.mxu3 }
  0xa4   : > { %761 = vst [vmem:[%s1406_s14 + $0x30] sm:$0xff] %v549_v28 }
  0xa5   : > { %762 = vst [vmem:[%s1406_s14 + $0x38] sm:$0xff] %v662_v29 }
  0xa6   : > { %v326_v31 = vpop.f32.mrf.mxu0  ;;  %v439_v32 = vpop.f32.mrf.mxu1 }
  0xa7   : > { %763 = vst [vmem:[%s1406_s14 + $0x40] sm:$0xff] %v326_v31  ;;  %v201_v31 = vld [vmem:[%s1320_s6 + $0xf8] sm:$0xff] }
  0xa8   : > { %1059 = vmatmul.msk.f32.gmra.mxu2 %vm206_vm0, %v188_v30  ;;  %1091 = vmatmul.msk.f32.gmra.mxu3 %vm206_vm0, %v188_v30  ;;  %764 = vst [vmem:[%s1406_s14 + $0x48] sm:$0xff] %v439_v32 }
  0xa9   : > { %995 = vmatmul.msk.f32.gmra.mxu0 %vm206_vm0, %v188_v30  ;;  %1027 = vmatmul.msk.f32.gmra.mxu1 %vm206_vm0, %v188_v30 }
  0xab   : > { %v552_v33 = vpop.f32.mrf.mxu2  ;;  %v665_v34 = vpop.f32.mrf.mxu3 }
  0xac   : > { %765 = vst [vmem:[%s1406_s14 + $0x50] sm:$0xff] %v552_v33 }
  0xad   : > { %766 = vst [vmem:[%s1406_s14 + $0x58] sm:$0xff] %v665_v34 }
  0xae   : > { %v329_v36 = vpop.f32.mrf.mxu0  ;;  %v442_v37 = vpop.f32.mrf.mxu1 }
  0xaf   : > { %767 = vst [vmem:[%s1406_s14 + $0x60] sm:$0xff] %v329_v36 }
  0xb0   : > { %1060 = vmatmul.msk.f32.gmra.mxu2 %vm206_vm0, %v189_v35  ;;  %1092 = vmatmul.msk.f32.gmra.mxu3 %vm206_vm0, %v189_v35  ;;  %768 = vst [vmem:[%s1406_s14 + $0x68] sm:$0xff] %v442_v37 }
  0xb1   : > { %996 = vmatmul.msk.f32.gmra.mxu0 %vm206_vm0, %v189_v35  ;;  %1028 = vmatmul.msk.f32.gmra.mxu1 %vm206_vm0, %v189_v35 }
  0xb3   : > { %v555_v38 = vpop.f32.mrf.mxu2  ;;  %v668_v39 = vpop.f32.mrf.mxu3 }
  0xb4   : > { %769 = vst [vmem:[%s1406_s14 + $0x70] sm:$0xff] %v555_v38 }
  0xb5   : > { %770 = vst [vmem:[%s1406_s14 + $0x78] sm:$0xff] %v668_v39 }
  0xb6   : > { %v332_v41 = vpop.f32.mrf.mxu0  ;;  %v445_v42 = vpop.f32.mrf.mxu1 }
  0xb7   : > { %771 = vst [vmem:[%s1406_s14 + $0x80] sm:$0xff] %v332_v41 }
  0xb8   : > { %1061 = vmatmul.msk.f32.gmra.mxu2 %vm206_vm0, %v190_v40  ;;  %1093 = vmatmul.msk.f32.gmra.mxu3 %vm206_vm0, %v190_v40  ;;  %772 = vst [vmem:[%s1406_s14 + $0x88] sm:$0xff] %v445_v42 }
  0xb9   : > { %997 = vmatmul.msk.f32.gmra.mxu0 %vm206_vm0, %v190_v40  ;;  %1029 = vmatmul.msk.f32.gmra.mxu1 %vm206_vm0, %v190_v40 }
  0xbb   : > { %v558_v43 = vpop.f32.mrf.mxu2  ;;  %v671_v44 = vpop.f32.mrf.mxu3 }
  0xbc   : > { %773 = vst [vmem:[%s1406_s14 + $0x90] sm:$0xff] %v558_v43 }
  0xbd   : > { %774 = vst [vmem:[%s1406_s14 + $0x98] sm:$0xff] %v671_v44 }
  0xbe   : > { %v335_v46 = vpop.f32.mrf.mxu0  ;;  %v448_v47 = vpop.f32.mrf.mxu1 }
  0xbf   : > { %775 = vst [vmem:[%s1406_s14 + $0xa0] sm:$0xff] %v335_v46 }
  0xc0   : > { %1062 = vmatmul.msk.f32.gmra.mxu2 %vm206_vm0, %v191_v45  ;;  %1094 = vmatmul.msk.f32.gmra.mxu3 %vm206_vm0, %v191_v45  ;;  %776 = vst [vmem:[%s1406_s14 + $0xa8] sm:$0xff] %v448_v47 }
  0xc1   : > { %998 = vmatmul.msk.f32.gmra.mxu0 %vm206_vm0, %v191_v45  ;;  %1030 = vmatmul.msk.f32.gmra.mxu1 %vm206_vm0, %v191_v45 }
  0xc3   : > { %v561_v48 = vpop.f32.mrf.mxu2  ;;  %v674_v49 = vpop.f32.mrf.mxu3 }
  0xc4   : > { %777 = vst [vmem:[%s1406_s14 + $0xb0] sm:$0xff] %v561_v48 }
  0xc5   : > { %778 = vst [vmem:[%s1406_s14 + $0xb8] sm:$0xff] %v674_v49 }
  0xc6   : > { %v338_v51 = vpop.f32.mrf.mxu0  ;;  %v451_v52 = vpop.f32.mrf.mxu1 }
  0xc7   : > { %779 = vst [vmem:[%s1406_s14 + $0xc0] sm:$0xff] %v338_v51 }
  0xc8   : > { %1063 = vmatmul.msk.f32.gmra.mxu2 %vm206_vm0, %v192_v50  ;;  %1095 = vmatmul.msk.f32.gmra.mxu3 %vm206_vm0, %v192_v50  ;;  %780 = vst [vmem:[%s1406_s14 + $0xc8] sm:$0xff] %v451_v52 }
  0xc9   : > { %999 = vmatmul.msk.f32.gmra.mxu0 %vm206_vm0, %v192_v50  ;;  %1031 = vmatmul.msk.f32.gmra.mxu1 %vm206_vm0, %v192_v50 }
  0xcb   : > { %v564_v53 = vpop.f32.mrf.mxu2  ;;  %v677_v54 = vpop.f32.mrf.mxu3 }
  0xcc   : > { %781 = vst [vmem:[%s1406_s14 + $0xd0] sm:$0xff] %v564_v53 }
  0xcd   : > { %782 = vst [vmem:[%s1406_s14 + $0xd8] sm:$0xff] %v677_v54 }
  0xce   : > { %v341_v56 = vpop.f32.mrf.mxu0  ;;  %v454_v57 = vpop.f32.mrf.mxu1 }
  0xcf   : > { %783 = vst [vmem:[%s1406_s14 + $0xe0] sm:$0xff] %v341_v56 }
  0xd0   : > { %1064 = vmatmul.msk.f32.gmra.mxu2 %vm206_vm0, %v193_v55  ;;  %1096 = vmatmul.msk.f32.gmra.mxu3 %vm206_vm0, %v193_v55  ;;  %784 = vst [vmem:[%s1406_s14 + $0xe8] sm:$0xff] %v454_v57 }
  0xd1   : > { %1000 = vmatmul.msk.f32.gmra.mxu0 %vm206_vm0, %v193_v55  ;;  %1032 = vmatmul.msk.f32.gmra.mxu1 %vm206_vm0, %v193_v55 }
  0xd3   : > { %v567_v58 = vpop.f32.mrf.mxu2  ;;  %v680_v59 = vpop.f32.mrf.mxu3 }
  0xd4   : > { %785 = vst [vmem:[%s1406_s14 + $0xf0] sm:$0xff] %v567_v58 }
  0xd5   : > { %786 = vst [vmem:[%s1406_s14 + $0xf8] sm:$0xff] %v680_v59 }
  0xd6   : > { %v344_v61 = vpop.f32.mrf.mxu0  ;;  %v457_v62 = vpop.f32.mrf.mxu1 }
  0xd7   : > { %787 = vst [vmem:[%s1406_s14 + $0x100] sm:$0xff] %v344_v61 }
  0xd8   : > { %1065 = vmatmul.msk.f32.gmra.mxu2 %vm206_vm0, %v194_v60  ;;  %1097 = vmatmul.msk.f32.gmra.mxu3 %vm206_vm0, %v194_v60  ;;  %788 = vst [vmem:[%s1406_s14 + $0x108] sm:$0xff] %v457_v62 }
  0xd9   : > { %1001 = vmatmul.msk.f32.gmra.mxu0 %vm206_vm0, %v194_v60  ;;  %1033 = vmatmul.msk.f32.gmra.mxu1 %vm206_vm0, %v194_v60 }
  0xdb   : > { %v570_v63 = vpop.f32.mrf.mxu2  ;;  %v683_v0 = vpop.f32.mrf.mxu3 }
  0xdc   : > { %789 = vst [vmem:[%s1406_s14 + $0x110] sm:$0xff] %v570_v63 }
  0xdd   : > { %790 = vst [vmem:[%s1406_s14 + $0x118] sm:$0xff] %v683_v0 }
  0xde   : > { %v347_v2 = vpop.f32.mrf.mxu0  ;;  %v460_v3 = vpop.f32.mrf.mxu1 }
  0xdf   : > { %791 = vst [vmem:[%s1406_s14 + $0x120] sm:$0xff] %v347_v2 }
  0xe0   : > { %1066 = vmatmul.msk.f32.gmra.mxu2 %vm206_vm0, %v195_v1  ;;  %1098 = vmatmul.msk.f32.gmra.mxu3 %vm206_vm0, %v195_v1  ;;  %792 = vst [vmem:[%s1406_s14 + $0x128] sm:$0xff] %v460_v3 }
  0xe1   : > { %1002 = vmatmul.msk.f32.gmra.mxu0 %vm206_vm0, %v195_v1  ;;  %1034 = vmatmul.msk.f32.gmra.mxu1 %vm206_vm0, %v195_v1 }
  0xe3   : > { %v573_v4 = vpop.f32.mrf.mxu2  ;;  %v686_v5 = vpop.f32.mrf.mxu3 }
  0xe4   : > { %793 = vst [vmem:[%s1406_s14 + $0x130] sm:$0xff] %v573_v4 }
  0xe5   : > { %794 = vst [vmem:[%s1406_s14 + $0x138] sm:$0xff] %v686_v5 }
  0xe6   : > { %v350_v7 = vpop.f32.mrf.mxu0  ;;  %v463_v8 = vpop.f32.mrf.mxu1 }
  0xe7   : > { %795 = vst [vmem:[%s1406_s14 + $0x140] sm:$0xff] %v350_v7 }
  0xe8   : > { %1067 = vmatmul.msk.f32.gmra.mxu2 %vm206_vm0, %v196_v6  ;;  %1099 = vmatmul.msk.f32.gmra.mxu3 %vm206_vm0, %v196_v6  ;;  %796 = vst [vmem:[%s1406_s14 + $0x148] sm:$0xff] %v463_v8 }
  0xe9   : > { %1003 = vmatmul.msk.f32.gmra.mxu0 %vm206_vm0, %v196_v6  ;;  %1035 = vmatmul.msk.f32.gmra.mxu1 %vm206_vm0, %v196_v6 }
  0xeb   : > { %v576_v9 = vpop.f32.mrf.mxu2  ;;  %v689_v10 = vpop.f32.mrf.mxu3 }
  0xec   : > { %797 = vst [vmem:[%s1406_s14 + $0x150] sm:$0xff] %v576_v9 }
  0xed   : > { %798 = vst [vmem:[%s1406_s14 + $0x158] sm:$0xff] %v689_v10 }
  0xee   : > { %v353_v12 = vpop.f32.mrf.mxu0  ;;  %v466_v13 = vpop.f32.mrf.mxu1 }
  0xef   : > { %799 = vst [vmem:[%s1406_s14 + $0x160] sm:$0xff] %v353_v12 }
  0xf0   : > { %1068 = vmatmul.msk.f32.gmra.mxu2 %vm206_vm0, %v197_v11  ;;  %1100 = vmatmul.msk.f32.gmra.mxu3 %vm206_vm0, %v197_v11  ;;  %800 = vst [vmem:[%s1406_s14 + $0x168] sm:$0xff] %v466_v13 }
  0xf1   : > { %1004 = vmatmul.msk.f32.gmra.mxu0 %vm206_vm0, %v197_v11  ;;  %1036 = vmatmul.msk.f32.gmra.mxu1 %vm206_vm0, %v197_v11 }
  0xf3   : > { %v579_v14 = vpop.f32.mrf.mxu2  ;;  %v692_v15 = vpop.f32.mrf.mxu3 }
  0xf4   : > { %801 = vst [vmem:[%s1406_s14 + $0x170] sm:$0xff] %v579_v14 }
  0xf5   : > { %802 = vst [vmem:[%s1406_s14 + $0x178] sm:$0xff] %v692_v15 }
  0xf6   : > { %v356_v17 = vpop.f32.mrf.mxu0  ;;  %v469_v18 = vpop.f32.mrf.mxu1 }
  0xf7   : > { %803 = vst [vmem:[%s1406_s14 + $0x180] sm:$0xff] %v356_v17 }
  0xf8   : > { %1069 = vmatmul.msk.f32.gmra.mxu2 %vm206_vm0, %v198_v16  ;;  %1101 = vmatmul.msk.f32.gmra.mxu3 %vm206_vm0, %v198_v16  ;;  %804 = vst [vmem:[%s1406_s14 + $0x188] sm:$0xff] %v469_v18 }
  0xf9   : > { %1005 = vmatmul.msk.f32.gmra.mxu0 %vm206_vm0, %v198_v16  ;;  %1037 = vmatmul.msk.f32.gmra.mxu1 %vm206_vm0, %v198_v16 }
  0xfb   : > { %v582_v19 = vpop.f32.mrf.mxu2  ;;  %v695_v20 = vpop.f32.mrf.mxu3 }
  0xfc   : > { %805 = vst [vmem:[%s1406_s14 + $0x190] sm:$0xff] %v582_v19 }
  0xfd   : > { %806 = vst [vmem:[%s1406_s14 + $0x198] sm:$0xff] %v695_v20 }
  0xfe   : > { %v359_v22 = vpop.f32.mrf.mxu0  ;;  %v472_v23 = vpop.f32.mrf.mxu1 }
  0xff   : > { %807 = vst [vmem:[%s1406_s14 + $0x1a0] sm:$0xff] %v359_v22 }
 0x100   : > { %1070 = vmatmul.msk.f32.gmra.mxu2 %vm206_vm0, %v199_v21  ;;  %1102 = vmatmul.msk.f32.gmra.mxu3 %vm206_vm0, %v199_v21  ;;  %808 = vst [vmem:[%s1406_s14 + $0x1a8] sm:$0xff] %v472_v23 }
 0x101   : > { %1006 = vmatmul.msk.f32.gmra.mxu0 %vm206_vm0, %v199_v21  ;;  %1038 = vmatmul.msk.f32.gmra.mxu1 %vm206_vm0, %v199_v21 }
 0x103   : > { %v585_v24 = vpop.f32.mrf.mxu2  ;;  %v698_v25 = vpop.f32.mrf.mxu3 }
 0x104   : > { %809 = vst [vmem:[%s1406_s14 + $0x1b0] sm:$0xff] %v585_v24 }
 0x105   : > { %810 = vst [vmem:[%s1406_s14 + $0x1b8] sm:$0xff] %v698_v25 }
 0x106   : > { %v362_v27 = vpop.f32.mrf.mxu0  ;;  %v475_v28 = vpop.f32.mrf.mxu1 }
 0x107   : > { %811 = vst [vmem:[%s1406_s14 + $0x1c0] sm:$0xff] %v362_v27 }
 0x108   : > { %1071 = vmatmul.msk.f32.gmra.mxu2 %vm206_vm0, %v200_v26  ;;  %1103 = vmatmul.msk.f32.gmra.mxu3 %vm206_vm0, %v200_v26  ;;  %812 = vst [vmem:[%s1406_s14 + $0x1c8] sm:$0xff] %v475_v28 }
 0x109   : > { %1007 = vmatmul.msk.f32.gmra.mxu0 %vm206_vm0, %v200_v26  ;;  %1039 = vmatmul.msk.f32.gmra.mxu1 %vm206_vm0, %v200_v26 }
 0x10b   : > { %v588_v29 = vpop.f32.mrf.mxu2  ;;  %v701_v30 = vpop.f32.mrf.mxu3 }
 0x10c   : > { %813 = vst [vmem:[%s1406_s14 + $0x1d0] sm:$0xff] %v588_v29 }
 0x10d   : > { %814 = vst [vmem:[%s1406_s14 + $0x1d8] sm:$0xff] %v701_v30 }
 0x10e   : > { %v365_v32 = vpop.f32.mrf.mxu0  ;;  %v478_v33 = vpop.f32.mrf.mxu1 }
 0x10f   : > { %815 = vst [vmem:[%s1406_s14 + $0x1e0] sm:$0xff] %v365_v32 }
 0x110   : > { %1072 = vmatmul.msk.f32.gmra.mxu2 %vm206_vm0, %v201_v31  ;;  %1104 = vmatmul.msk.f32.gmra.mxu3 %vm206_vm0, %v201_v31  ;;  %816 = vst [vmem:[%s1406_s14 + $0x1e8] sm:$0xff] %v478_v33 }
 0x111   : > { %1008 = vmatmul.msk.f32.gmra.mxu0 %vm206_vm0, %v201_v31  ;;  %1040 = vmatmul.msk.f32.gmra.mxu1 %vm206_vm0, %v201_v31 }
 0x113   : > { %v591_v34 = vpop.f32.mrf.mxu2  ;;  %v704_v35 = vpop.f32.mrf.mxu3 }
 0x114   : > { %817 = vst [vmem:[%s1406_s14 + $0x1f0] sm:$0xff] %v591_v34 }
 0x115   : > { %818 = vst [vmem:[%s1406_s14 + $0x1f8] sm:$0xff] %v704_v35 }
 0x116   : > { %v368_v36 = vpop.f32.mrf.mxu0  ;;  %v481_v37 = vpop.f32.mrf.mxu1 }
 0x117   : > { %819 = vst [vmem:[%s1406_s14 + $0x200] sm:$0xff] %v368_v36 }
 0x118   : > { %820 = vst [vmem:[%s1406_s14 + $0x208] sm:$0xff] %v481_v37 }
 0x11b   : > { %v594_v38 = vpop.f32.mrf.mxu2  ;;  %v707_v39 = vpop.f32.mrf.mxu3 }
 0x11c   : > { %821 = vst [vmem:[%s1406_s14 + $0x210] sm:$0xff] %v594_v38 }
 0x11d   : > { %822 = vst [vmem:[%s1406_s14 + $0x218] sm:$0xff] %v707_v39 }
 0x11e   : > { %v371_v40 = vpop.f32.mrf.mxu0  ;;  %v484_v41 = vpop.f32.mrf.mxu1 }
 0x11f   : > { %823 = vst [vmem:[%s1406_s14 + $0x220] sm:$0xff] %v371_v40 }
 0x120   : > { %824 = vst [vmem:[%s1406_s14 + $0x228] sm:$0xff] %v484_v41 }
 0x123   : > { %v597_v42 = vpop.f32.mrf.mxu2  ;;  %v710_v43 = vpop.f32.mrf.mxu3 }
 0x124   : > { %825 = vst [vmem:[%s1406_s14 + $0x230] sm:$0xff] %v597_v42 }
 0x125   : > { %826 = vst [vmem:[%s1406_s14 + $0x238] sm:$0xff] %v710_v43 }
 0x126   : > { %v374_v44 = vpop.f32.mrf.mxu0  ;;  %v487_v45 = vpop.f32.mrf.mxu1 }
 0x127   : > { %827 = vst [vmem:[%s1406_s14 + $0x240] sm:$0xff] %v374_v44 }
 0x128   : > { %828 = vst [vmem:[%s1406_s14 + $0x248] sm:$0xff] %v487_v45 }
 0x12b   : > { %v600_v46 = vpop.f32.mrf.mxu2  ;;  %v713_v47 = vpop.f32.mrf.mxu3 }
 0x12c   : > { %829 = vst [vmem:[%s1406_s14 + $0x250] sm:$0xff] %v600_v46 }
 0x12d   : > { %830 = vst [vmem:[%s1406_s14 + $0x258] sm:$0xff] %v713_v47 }
 0x12e   : > { %v377_v48 = vpop.f32.mrf.mxu0  ;;  %v490_v49 = vpop.f32.mrf.mxu1 }
 0x12f   : > { %831 = vst [vmem:[%s1406_s14 + $0x260] sm:$0xff] %v377_v48 }
 0x130   : > { %832 = vst [vmem:[%s1406_s14 + $0x268] sm:$0xff] %v490_v49 }
 0x133   : > { %v603_v50 = vpop.f32.mrf.mxu2  ;;  %v716_v51 = vpop.f32.mrf.mxu3 }
 0x134   : > { %833 = vst [vmem:[%s1406_s14 + $0x270] sm:$0xff] %v603_v50 }
 0x135   : > { %834 = vst [vmem:[%s1406_s14 + $0x278] sm:$0xff] %v716_v51 }
 0x136   : > { %v380_v52 = vpop.f32.mrf.mxu0  ;;  %v493_v53 = vpop.f32.mrf.mxu1 }
 0x137   : > { %835 = vst [vmem:[%s1406_s14 + $0x280] sm:$0xff] %v380_v52 }
 0x138   : > { %836 = vst [vmem:[%s1406_s14 + $0x288] sm:$0xff] %v493_v53 }
 0x13b   : > { %v606_v54 = vpop.f32.mrf.mxu2  ;;  %v719_v55 = vpop.f32.mrf.mxu3 }
 0x13c   : > { %837 = vst [vmem:[%s1406_s14 + $0x290] sm:$0xff] %v606_v54 }
 0x13d   : > { %838 = vst [vmem:[%s1406_s14 + $0x298] sm:$0xff] %v719_v55 }
 0x13e   : > { %v383_v56 = vpop.f32.mrf.mxu0  ;;  %v496_v57 = vpop.f32.mrf.mxu1 }
 0x13f   : > { %839 = vst [vmem:[%s1406_s14 + $0x2a0] sm:$0xff] %v383_v56 }
 0x140   : > { %840 = vst [vmem:[%s1406_s14 + $0x2a8] sm:$0xff] %v496_v57 }
 0x143   : > { %v609_v58 = vpop.f32.mrf.mxu2  ;;  %v722_v59 = vpop.f32.mrf.mxu3 }
 0x144   : > { %841 = vst [vmem:[%s1406_s14 + $0x2b0] sm:$0xff] %v609_v58 }
 0x145   : > { %842 = vst [vmem:[%s1406_s14 + $0x2b8] sm:$0xff] %v722_v59 }
 0x146   : > { %v386_v60 = vpop.f32.mrf.mxu0  ;;  %v499_v61 = vpop.f32.mrf.mxu1 }
 0x147   : > { %843 = vst [vmem:[%s1406_s14 + $0x2c0] sm:$0xff] %v386_v60 }
 0x148   : > { %844 = vst [vmem:[%s1406_s14 + $0x2c8] sm:$0xff] %v499_v61 }
 0x14b   : > { %v612_v62 = vpop.f32.mrf.mxu2  ;;  %v725_v63 = vpop.f32.mrf.mxu3 }
 0x14c   : > { %845 = vst [vmem:[%s1406_s14 + $0x2d0] sm:$0xff] %v612_v62 }
 0x14d   : > { %846 = vst [vmem:[%s1406_s14 + $0x2d8] sm:$0xff] %v725_v63 }
 0x14e   : > { %v389_v0 = vpop.f32.mrf.mxu0  ;;  %v502_v1 = vpop.f32.mrf.mxu1 }
 0x14f   : > { %847 = vst [vmem:[%s1406_s14 + $0x2e0] sm:$0xff] %v389_v0 }
 0x150   : > { %848 = vst [vmem:[%s1406_s14 + $0x2e8] sm:$0xff] %v502_v1 }
 0x153   : > { %v615_v2 = vpop.f32.mrf.mxu2  ;;  %v728_v3 = vpop.f32.mrf.mxu3 }
 0x154   : > { %849 = vst [vmem:[%s1406_s14 + $0x2f0] sm:$0xff] %v615_v2 }
 0x155   : > { %850 = vst [vmem:[%s1406_s14 + $0x2f8] sm:$0xff] %v728_v3 }
 0x156   : > { %v392_v4 = vpop.f32.mrf.mxu0  ;;  %v505_v5 = vpop.f32.mrf.mxu1 }
 0x157   : > { %851 = vst [vmem:[%s1406_s14 + $0x300] sm:$0xff] %v392_v4 }
 0x158   : > { %852 = vst [vmem:[%s1406_s14 + $0x308] sm:$0xff] %v505_v5 }
 0x15b   : > { %v618_v6 = vpop.f32.mrf.mxu2  ;;  %v731_v7 = vpop.f32.mrf.mxu3 }
 0x15c   : > { %853 = vst [vmem:[%s1406_s14 + $0x310] sm:$0xff] %v618_v6 }
 0x15d   : > { %854 = vst [vmem:[%s1406_s14 + $0x318] sm:$0xff] %v731_v7 }
 0x15e   : > { %v395_v8 = vpop.f32.mrf.mxu0  ;;  %v508_v9 = vpop.f32.mrf.mxu1 }
 0x15f   : > { %855 = vst [vmem:[%s1406_s14 + $0x320] sm:$0xff] %v395_v8 }
 0x160   : > { %856 = vst [vmem:[%s1406_s14 + $0x328] sm:$0xff] %v508_v9 }
 0x163   : > { %v621_v10 = vpop.f32.mrf.mxu2  ;;  %v734_v11 = vpop.f32.mrf.mxu3 }
 0x164   : > { %857 = vst [vmem:[%s1406_s14 + $0x330] sm:$0xff] %v621_v10 }
 0x165   : > { %858 = vst [vmem:[%s1406_s14 + $0x338] sm:$0xff] %v734_v11 }
 0x166   : > { %v398_v12 = vpop.f32.mrf.mxu0  ;;  %v511_v13 = vpop.f32.mrf.mxu1 }
 0x167   : > { %859 = vst [vmem:[%s1406_s14 + $0x340] sm:$0xff] %v398_v12 }
 0x168   : > { %860 = vst [vmem:[%s1406_s14 + $0x348] sm:$0xff] %v511_v13 }
 0x16b   : > { %v624_v14 = vpop.f32.mrf.mxu2  ;;  %v737_v15 = vpop.f32.mrf.mxu3 }
 0x16c   : > { %861 = vst [vmem:[%s1406_s14 + $0x350] sm:$0xff] %v624_v14 }
 0x16d   : > { %862 = vst [vmem:[%s1406_s14 + $0x358] sm:$0xff] %v737_v15 }
 0x16e   : > { %v401_v16 = vpop.f32.mrf.mxu0  ;;  %v514_v17 = vpop.f32.mrf.mxu1 }
 0x16f   : > { %863 = vst [vmem:[%s1406_s14 + $0x360] sm:$0xff] %v401_v16 }
 0x170   : > { %864 = vst [vmem:[%s1406_s14 + $0x368] sm:$0xff] %v514_v17 }
 0x173   : > { %v627_v18 = vpop.f32.mrf.mxu2  ;;  %v740_v19 = vpop.f32.mrf.mxu3 }
 0x174   : > { %865 = vst [vmem:[%s1406_s14 + $0x370] sm:$0xff] %v627_v18 }
 0x175   : > { %866 = vst [vmem:[%s1406_s14 + $0x378] sm:$0xff] %v740_v19 }
 0x176   : > { %v404_v20 = vpop.f32.mrf.mxu0  ;;  %v517_v21 = vpop.f32.mrf.mxu1 }
 0x177   : > { %867 = vst [vmem:[%s1406_s14 + $0x380] sm:$0xff] %v404_v20 }
 0x178   : > { %868 = vst [vmem:[%s1406_s14 + $0x388] sm:$0xff] %v517_v21 }
 0x17b   : > { %v630_v22 = vpop.f32.mrf.mxu2  ;;  %v743_v23 = vpop.f32.mrf.mxu3 }
 0x17c   : > { %869 = vst [vmem:[%s1406_s14 + $0x390] sm:$0xff] %v630_v22 }
 0x17d   : > { %870 = vst [vmem:[%s1406_s14 + $0x398] sm:$0xff] %v743_v23 }
 0x17e   : > { %v407_v24 = vpop.f32.mrf.mxu0  ;;  %v520_v25 = vpop.f32.mrf.mxu1 }
 0x17f   : > { %871 = vst [vmem:[%s1406_s14 + $0x3a0] sm:$0xff] %v407_v24 }
 0x180   : > { %872 = vst [vmem:[%s1406_s14 + $0x3a8] sm:$0xff] %v520_v25 }
 0x183   : > { %v633_v26 = vpop.f32.mrf.mxu2  ;;  %v746_v27 = vpop.f32.mrf.mxu3 }
 0x184   : > { %873 = vst [vmem:[%s1406_s14 + $0x3b0] sm:$0xff] %v633_v26 }
 0x185   : > { %874 = vst [vmem:[%s1406_s14 + $0x3b8] sm:$0xff] %v746_v27 }
 0x186   : > { %v410_v28 = vpop.f32.mrf.mxu0  ;;  %v523_v29 = vpop.f32.mrf.mxu1 }
 0x187   : > { %875 = vst [vmem:[%s1406_s14 + $0x3c0] sm:$0xff] %v410_v28 }
 0x188   : > { %876 = vst [vmem:[%s1406_s14 + $0x3c8] sm:$0xff] %v523_v29 }
 0x18b   : > { %v636_v30 = vpop.f32.mrf.mxu2  ;;  %v749_v31 = vpop.f32.mrf.mxu3 }
 0x18c   : > { %877 = vst [vmem:[%s1406_s14 + $0x3d0] sm:$0xff] %v636_v30 }
 0x18d   : > { %878 = vst [vmem:[%s1406_s14 + $0x3d8] sm:$0xff] %v749_v31 }
 0x18e   : > { %v413_v32 = vpop.f32.mrf.mxu0  ;;  %v526_v33 = vpop.f32.mrf.mxu1 }
 0x18f   : > { %879 = vst [vmem:[%s1406_s14 + $0x3e0] sm:$0xff] %v413_v32 }
 0x190   : > { %880 = vst [vmem:[%s1406_s14 + $0x3e8] sm:$0xff] %v526_v33 }
 0x191   : > { %890 = sbr.rel (!%p1290_p5) target bundleno = 437 (0x1b5), region = 32 }
 0x193   : > { %v639_v34 = vpop.f32.mrf.mxu2  ;;  %v752_v35 = vpop.f32.mrf.mxu3 }
 0x194   : > { %881 = vst [vmem:[%s1406_s14 + $0x3f0] sm:$0xff] %v639_v34 }
 0x195   : > { %882 = vst [vmem:[%s1406_s14 + $0x3f8] sm:$0xff] %v752_v35 }
 0x196   : > { %s1689_s17 = smov (!%p893_p11, %s892_s17), 32 }
 0x197   : > { %s1116_s21 = sshll.u32 %s1689_s17, 5 }
 0x198   : > { %s897_s22 = ssub.s32 1024, %s1116_s21 }
 0x199   : > { %s898_s23 = sshll.u32 %s897_s22, 4 }
 0x19a   : > { %899 = vsyncadd %s1617_s16, %s898_s23  ;;  %p1626_p12 = scmp.ne.s32.totalorder %s1116_s21, 0  ;;  %s1118_s19 = sshll.u32 %s1273_s13, 10 }
 0x19b   : > { %s903_s27 = scalar_lea.hbm %s1680_s2, %s1118_s19  ;;  %s905_s28 = sshll.u32 %s1406_s14, 4  ;;  %s1635_s28 = int_to_ptr.vmem [resolvable:$true] %s905_s28 }
 0x19c   : > { %s907_s29 = sshll.u32 %s903_s27, 4  ;;  %s1113_s30 = sshll.u32 %s1689_s17, 9  ;;  %s1637_s29 = int_to_ptr.hbm [resolvable:$true] %s907_s29 }
 0x19d   : > { %s1159_s3 = sshra.s32 %s1635_s28, 4  ;;  %s1161_s4 = sshrl.u32 %s1113_s30, 4  ;;  %s1160_s3 = int_to_ptr.vmem [resolvable:$true] %s1159_s3 }
 0x19e   : > { %s1166_s5 = scalar_lea.vmem %s1160_s3, %s1161_s4  ;;  %s1234_s13 = smov [#allocation2]  }
 0x19f   : > { %p1167_p13 = scmp.ne.s32.totalorder %s1160_s3, %s1166_s5  ;;  %s1170_s6 = scalar_lea.vmem %s1234_s13, 2048 }
 0x1a0   : > { %p1172_p2 = scmp.lt.s32.totalorder %s1170_s6, %s1166_s5 }
 0x1a1   : > { %p1168_p0 = pnand %p1167_p13, %p1626_p12 }
 0x1a3   : > { %p1169_p1 = pneg %p1168_p0 }
 0x1a5   : > { %p1174_p3 = pnand %p1172_p2, %p1169_p1 }
 0x1a7   : > { %1177 = shalt.err (!%p1174_p3)
}
 0x1a8   : > { %s1178_s7 = sshra.s32 %s1637_s29, 4  ;;  %s1189_s22 = scalar_lea.hbm %s1680_s2, 2016  ;;  %s1179_s7 = int_to_ptr.hbm [resolvable:$true] %s1178_s7 }
 0x1a9   : > { %s1185_s8 = scalar_lea.hbm %s1179_s7, %s1161_s4  ;;  %p1190_p8 = scmp.lt.s32.totalorder %s1179_s7, %s1680_s2 }
 0x1aa   : > { %p1186_p4 = scmp.ne.s32.totalorder %s1179_s7, %s1185_s8  ;;  %p1191_p9 = scmp.lt.s32.totalorder %s1189_s22, %s1185_s8 }
 0x1ac   : > { %p1187_p5 = pnand %p1186_p4, %p1626_p12  ;;  %p1192_p10 = por %p1191_p9, %p1190_p8 }
 0x1ae   : > { %p1188_p7 = pneg %p1187_p5 }
 0x1b0   : > { %p1193_p11 = pnand %p1192_p10, %p1188_p7 }
 0x1b2   : > { %1196 = shalt.err (!%p1193_p11)
}
 0x1b3   : > { %s1235_s26 = smov 512   ;;  %s1236_s25 = smov 32  }
 0x1b4   : > { %913 = dma.vmem_to_hbm [thread:$0]  (%p1626_p12), %s1635_s28, %s1113_s30, %s1637_s29, %s1617_s16, %s1235_s26, %s1235_s26, %s1236_s25  }
 0x1b5 PF: > { %p1124_p13 = scmp.ge.s32.totalorder %s1232_s12, 2  ;;  %s922_s27 = sand.u32 1, %s1220_s9  }
 0x1b6   : > { %s923_s3 = scalar_lea.sflag [#allocation3], %s922_s27 }
 0x1b7   : > { %p1121_p0 = pnand %p1124_p13, %p1294_p6 }
 0x1b9   : > { %p1122_p1 = pneg %p1121_p0 }
 0x1bb   : > { %1215 = dma.done.wait (%p1122_p1), %s923_s3, 16384  }
 0x1bc   : > { %1217 = vsyncadd (%p1122_p1), %s923_s3, 4294950912  ;;  %p12_p2 = scmp.ge.s32.totalorder %s1277_s15, 4   ;;  %s1684_s9 = smov %s1224_s10 }
 0x1bd   : > { %s1685_s10 = smov %s1228_s11  ;;  %s1686_s11 = smov %s1288_s18 }
 0x1be   : > { %s1687_s12 = smov %s1277_s15  ;;  %14 = sbr.rel (!%p12_p2) target bundleno = 3 (0x3), region = 63 }
 0x1c3   :  { %929 = vsyncpa [#allocation3], 1 }
 0x1c4   :  { %931 = vsyncpa [#allocation3 + $0x1], 1 }

</bundles_post_ra>
